<compile_context>
chip_gen: v6e
topology: v6e:2x2x1
jax: 0.10.0
libtpu: 0.0.40
codegen_flags: <defaults>
</compile_context>

<pallas_src>
import jax
import jax.numpy as jnp
from jax.experimental import pallas as pl
from jax.experimental.pallas import tpu as pltpu


def _round_up(x: int, m: int) -> int:
    return (x + m - 1) // m * m


def _pick_tile(dim: int, base: int, cap: int):
    """Pad `dim` to a multiple of `base`; pick the largest tile that is a
    multiple of `base`, divides the padded dim exactly, and is <= cap.

    Keeps padding waste to at most one `base`-sized group instead of rounding
    the whole array up to a fixed large tile (e.g. Dout=600 pads to 640, not
    1024)."""
    dim_pad = _round_up(dim, base)
    units = dim_pad // base
    max_units = max(1, cap // base)
    best = 1
    for d in range(1, min(units, max_units) + 1):
        if units % d == 0:
            best = d
    return best * base, dim_pad


def _dense_kernel(x_ref, w_ref, b_ref, o_ref):
    """One (tm, tn) output tile of y = x @ W.T + b.

    x_ref: (tm, tk) bf16   activations tile
    w_ref: (tk, tn) bf16   weight tile (already transposed to (Din, Dout))
    b_ref: (1, tn)  f32    bias tile
    o_ref: (tm, tn) f32    output tile; doubles as the K accumulator — its
                           block index is k-invariant so it stays VMEM-resident
                           across the whole reduction axis.
    """
    k = pl.program_id(2)

    # Initialize the resident output tile with the bias at the first K step:
    # no zero-fill, no scratch accumulator, no finalize copy/add pass.
    @pl.when(k == 0)
    def _init():
        o_ref[...] = jnp.broadcast_to(b_ref[...], o_ref.shape)

    # bf16 x bf16 -> f32 on the MXU, accumulated in f32 directly in o_ref.
    o_ref[...] += jnp.dot(
        x_ref[...], w_ref[...], preferred_element_type=jnp.float32
    )


@jax.jit
def dense_layer_forward(x, weight, bias):
    """y = x @ weight.T + bias computed in a Pallas TPU kernel.

    x:      (B, Din)    float32
    weight: (Dout, Din) float32  (PyTorch nn.Linear convention)
    bias:   (Dout,)     float32
    returns (B, Dout)   float32
    """
    B, Din = x.shape
    Dout = weight.shape[0]

    # --- Tile selection (padding-minimizing, lane/sublane dense) -----------
    tm, B_pad = _pick_tile(B, 16, 256)       # 16: bf16 sublane packing for x
    tn, Dout_pad = _pick_tile(Dout, 128, 512)
    tk, Din_pad = _pick_tile(Din, 128, 1024)

    # --- bf16 cast + pad (+ fold the W transpose into this same copy) ------
    # Zero K-padding is contraction-neutral; padded batch rows / output
    # columns are sliced off below.
    x_p = x.astype(jnp.bfloat16)
    if (B_pad, Din_pad) != (B, Din):
        x_p = jnp.pad(x_p, ((0, B_pad - B), (0, Din_pad - Din)))

    w_p = weight.T.astype(jnp.bfloat16)      # (Din, Dout), cast+transpose fused
    if (Din_pad, Dout_pad) != (Din, Dout):
        w_p = jnp.pad(w_p, ((0, Din_pad - Din), (0, Dout_pad - Dout)))

    b_p = bias.astype(jnp.float32).reshape(1, Dout)
    if Dout_pad != Dout:
        b_p = jnp.pad(b_p, ((0, 0), (0, Dout_pad - Dout)))

    grid = (B_pad // tm, Dout_pad // tn, Din_pad // tk)

    out_padded = pl.pallas_call(
        _dense_kernel,
        out_shape=jax.ShapeDtypeStruct((B_pad, Dout_pad), jnp.float32),
        grid=grid,
        in_specs=[
            pl.BlockSpec((tm, tk), lambda i, j, k: (i, k)),   # x tile
            pl.BlockSpec((tk, tn), lambda i, j, k: (k, j)),   # W.T tile
            pl.BlockSpec((1, tn), lambda i, j, k: (0, j)),    # bias tile
        ],
        out_specs=pl.BlockSpec((tm, tn), lambda i, j, k: (i, j)),
        compiler_params=pltpu.CompilerParams(
            # M, N shard across TensorCores (v7x megacore); K is the reduction.
            dimension_semantics=("parallel", "parallel", "arbitrary"),
        ),
    )(x_p, w_p, b_p)

    return out_padded[:B, :Dout]


def reference_forward(x, weight, bias):
    return x @ weight.T + bias


if __name__ == "__main__":
    # Module hyper-parameters (small, consistent with the forward).
    in_features = 4
    num_edges = 8
    out_features = 8
    batch = 2

    din = in_features * num_edges      # 32
    dout = out_features * num_edges    # 64

    key = jax.random.PRNGKey(0)
    kx, kw, kb = jax.random.split(key, 3)

    # Deterministic parameter init (nn.Linear-style uniform bound 1/sqrt(fan_in)).
    bound = 1.0 / jnp.sqrt(jnp.float32(din))
    weight = jax.random.uniform(kw, (dout, din), jnp.float32, -bound, bound)
    bias = jax.random.uniform(kb, (dout,), jnp.float32, -bound, bound)

    x = jax.random.normal(kx, (batch, din), jnp.float32)

    y = jax.block_until_ready(dense_layer_forward(x, weight, bias))

    y_ref = reference_forward(x, weight, bias)
    assert y.shape == (batch, dout)
    assert y.dtype == jnp.float32
    # bf16 inputs with f32 accumulate -> tolerance-level (not bit-exact) match
    # against the f32 reference.
    assert jnp.allclose(y, y_ref, atol=2e-2, rtol=2e-2), "mismatch vs reference"

    print("KERNEL_OK")
</pallas_src>

<mosaic_0001>
module attributes {stable_mosaic.version = 11 : i64} {
  func.func @_dense_kernel(%arg0: i32, %arg1: i32, %arg2: i32, %arg3: memref<16x128xbf16, #tpu.memory_space<vmem>>, %arg4: memref<128x128xbf16, #tpu.memory_space<vmem>>, %arg5: memref<1x128xf32, #tpu.memory_space<vmem>>, %arg6: memref<16x128xf32, #tpu.memory_space<vmem>>) attributes {dimension_semantics = [#tpu.dimension_semantics<parallel>, #tpu.dimension_semantics<parallel>, #tpu.dimension_semantics<arbitrary>], iteration_bounds = array<i64: 1, 1, 1>, scalar_prefetch = 0 : i64, scratch_operands = 0 : i64, tpu.core_type = #tpu.core_type<tc>, window_params = [{transform_indices = @transform_0, window_bounds = array<i64: 16, 128>}, {transform_indices = @transform_1, window_bounds = array<i64: 128, 128>}, {transform_indices = @transform_2, window_bounds = array<i64: 1, 128>}, {transform_indices = @transform_3, window_bounds = array<i64: 16, 128>}]} {
    %c0_i32 = arith.constant 0 : i32
    %0 = arith.cmpi eq, %arg2, %c0_i32 : i32
    %1 = arith.extui %0 : i1 to i32
    %c0_i32_0 = arith.constant 0 : i32
    %2 = arith.cmpi ne, %1, %c0_i32_0 : i32
    scf.if %2 {
      %c0_8 = arith.constant 0 : index
      %c0_9 = arith.constant 0 : index
      %9 = vector.load %arg5[%c0_8, %c0_9] : memref<1x128xf32, #tpu.memory_space<vmem>>, vector<1x128xf32>
      %10 = vector.shape_cast %9 : vector<1x128xf32> to vector<1x128xf32>
      %11 = vector.broadcast %10 : vector<1x128xf32> to vector<16x128xf32>
      %c0_10 = arith.constant 0 : index
      %c0_11 = arith.constant 0 : index
      %12 = vector.load %arg6[%c0_10, %c0_11] : memref<16x128xf32, #tpu.memory_space<vmem>>, vector<16x128xf32>
      tpu.vector_store %arg6[%c0_10, %c0_11], %11 {strides = array<i32>} : memref<16x128xf32, #tpu.memory_space<vmem>>, vector<16x128xf32>,
    } else {
    }
    %c0 = arith.constant 0 : index
    %c0_1 = arith.constant 0 : index
    %3 = vector.load %arg6[%c0, %c0_1] : memref<16x128xf32, #tpu.memory_space<vmem>>, vector<16x128xf32>
    %c0_2 = arith.constant 0 : index
    %c0_3 = arith.constant 0 : index
    %4 = vector.load %arg3[%c0_2, %c0_3] : memref<16x128xbf16, #tpu.memory_space<vmem>>, vector<16x128xbf16>
    %c0_4 = arith.constant 0 : index
    %c0_5 = arith.constant 0 : index
    %5 = vector.load %arg4[%c0_4, %c0_5] : memref<128x128xbf16, #tpu.memory_space<vmem>>, vector<128x128xbf16>
    %cst = arith.constant dense<0.000000e+00> : vector<16x128xf32>
    %6 = tpu.matmul %4, %5, %cst {dimension_numbers = #tpu.dot_dimension_numbers<[1], [0], [0], [1], [0, 0, 1, 1], [], []>} : vector<16x128xbf16>, vector<128x128xbf16>, vector<16x128xf32> -> vector<16x128xf32>
    %7 = arith.addf %3, %6 : vector<16x128xf32>
    %c0_6 = arith.constant 0 : index
    %c0_7 = arith.constant 0 : index
    %8 = vector.load %arg6[%c0_6, %c0_7] : memref<16x128xf32, #tpu.memory_space<vmem>>, vector<16x128xf32>
    tpu.vector_store %arg6[%c0_6, %c0_7], %7 {strides = array<i32>} : memref<16x128xf32, #tpu.memory_space<vmem>>, vector<16x128xf32>,
    return
  }
  func.func @transform_0(%arg0: i32, %arg1: i32, %arg2: i32) -> (i32, i32) {
    %c0_i32 = arith.constant 0 : i32
    return %arg0, %arg2 : i32, i32
  }
  func.func @transform_1(%arg0: i32, %arg1: i32, %arg2: i32) -> (i32, i32) {
    %c0_i32 = arith.constant 0 : i32
    return %arg2, %arg1 : i32, i32
  }
  func.func @transform_2(%arg0: i32, %arg1: i32, %arg2: i32) -> (i32, i32) {
    %c0_i32 = arith.constant 0 : i32
    %c0_i32_0 = arith.constant 0 : i32
    return %c0_i32, %arg1 : i32, i32
  }
  func.func @transform_3(%arg0: i32, %arg1: i32, %arg2: i32) -> (i32, i32) {
    %c0_i32 = arith.constant 0 : i32
    return %arg0, %arg1 : i32, i32
  }
}

</mosaic_0001>

<bundles_post_ra>
// kernel: dense_layer_forward.1
= control target key start
LH: loop header
LB: loop body
LE: loop exit
PB: predicated region body
PF: predicated region fallthrough
CT: control target
= control target key end

     0   :  { %v201_v0 = vmov 0.0   ;;  %vm202_vm0 = vmmov 0   ;;  %s259_s1 = inlined_call_operand.vmem [shape: bf16[128,128], index: 1, kind: input, shape index: {}]   ;;  %s260_s0 = inlined_call_operand.vmem [shape: bf16[16,128], index: 0, kind: input, shape index: {}]   ;;  %s261_s2 = inlined_call_operand.vmem [shape: f32[1,128], index: 2, kind: input, shape index: {}]   ;;  %s262_s3 = inlined_call_operand.vmem [shape: f32[16,128], index: 3, kind: output, shape index: {}]  }
   0x1   :  { %170 = vmatprep.subr.bf16.mxu0 %v201_v0  ;;  %v192_v1 = vld [vmem:[%s259_s1 + $0x38] sm:$0xff]   ;;  %186 = vmatprep.mubr.msk.bf16.mxu0 %vm202_vm0, %v201_v0  ;;  %v193_v2 = vld [vmem:[%s259_s1 + $0x30] sm:$0xff]   ;;  %v194_v3 = vld [vmem:[%s259_s1 + $0x28] sm:$0xff]  }
   0x2   :  { %171 = vmatpush3.bf16.msra.mxu0 %v192_v1  ;;  %v195_v4 = vld [vmem:[%s259_s1 + $0x20] sm:$0xff]   ;;  %v196_v5 = vld [vmem:[%s259_s1 + $0x18] sm:$0xff]   ;;  %v197_v6 = vld [vmem:[%s259_s1 + $0x10] sm:$0xff]  }
   0x3   :  { %172 = vmatprep.subr.bf16.mxu0 %v201_v0  ;;  %v198_v7 = vld [vmem:[%s259_s1 + $0x8] sm:$0xff]   ;;  %v199_v8 = vld [vmem:[%s259_s1] sm:$0xff]  }
   0x4   :  { %v200_v9 = vld [vmem:[%s260_s0] sm:$0xff]  }
   0x5   :  { %v151_v10 = vld [vmem:[%s261_s2] ss:$0 sm:$0xff] }
   0x6   :  { %173 = vmatpush3.bf16.msra.mxu0 %v193_v2 }
   0x7   :  { %174 = vmatprep.subr.bf16.mxu0 %v201_v0 }
   0xa   :  { %175 = vmatpush3.bf16.msra.mxu0 %v194_v3 }
   0xb   :  { %176 = vmatprep.subr.bf16.mxu0 %v201_v0 }
   0xe   :  { %177 = vmatpush3.bf16.msra.mxu0 %v195_v4 }
   0xf   :  { %178 = vmatprep.subr.bf16.mxu0 %v201_v0 }
  0x12   :  { %179 = vmatpush3.bf16.msra.mxu0 %v196_v5 }
  0x13   :  { %180 = vmatprep.subr.bf16.mxu0 %v201_v0 }
  0x16   :  { %181 = vmatpush3.bf16.msra.mxu0 %v197_v6 }
  0x17   :  { %182 = vmatprep.subr.bf16.mxu0 %v201_v0 }
  0x1a   :  { %183 = vmatpush3.bf16.msra.mxu0 %v198_v7 }
  0x1b   :  { %184 = vmatprep.subr.bf16.mxu0 %v201_v0 }
  0x1e   :  { %185 = vmatpush3.bf16.msra.mxu0 %v199_v8 }
  0x21   :  { %187 = vmatmul.mubr.bf16.vlgmr.msra.gmra.mxu0 %v200_v9 }
  0xe1   :  { %v136_v11 = vpop.f32.mrf.mxu0 }
  0xe2   :  { %v143_v12 = vadd.f32 %v151_v10, %v136_v11 }
  0xe3   :  { %v188_v13 = vpop.f32.mrf.mxu0 }
  0xe4   :  { %145 = vst [vmem:[%s262_s3] sm:$0xff] %v143_v12 }
  0xe5   :  { %v139_v14 = vpop.f32.mrf.mxu0 }
  0xe6   :  { %v144_v15 = vadd.f32 %v151_v10, %v139_v14 }
  0xe7   :  { %v189_v16 = vpop.f32.mrf.mxu0 }
  0xe8   :  { %146 = vst [vmem:[%s262_s3 + $0x8] sm:$0xff] %v144_v15 }

</bundles_post_ra>
